<compile_context>
chip_gen: v5e
topology: v5e:2x2
jax: 0.10.0
libtpu: 0.0.40
codegen_flags: <defaults>
</compile_context>

<pallas_src>
import jax
import jax.numpy as jnp
from jax import lax
from jax.experimental import pallas as pl
from jax.experimental.pallas import tpu as pltpu

K = 11  # conv kernel size (from the module __init__)


def _abs_conv_matmul_kernel(wc_ref, wd_ref, pc_ref, pd_ref, oc_ref, od_ref):
    """One grid step: (Cout, Kc) @ (Kc, imgs*HW) per half, lane-merged over images.

    wc_ref: (Cout, Cin*K*K)       bf16  |weight| flattened as (Cin, kh, kw)
    wd_ref: (Cout, K*K)           bf16  |weight| summed over Cin (density identity)
    pc_ref: (Cin*K*K, imgs*HW)    bf16  im2col patches of ctx_signal
    pd_ref: (K*K,     imgs*HW)    bf16  im2col patches of density (Cin = 1)
    oc_ref/od_ref: (Cout, imgs*HW) f32  lane-dense outputs
    """
    oc_ref[...] = jnp.dot(
        wc_ref[...], pc_ref[...], preferred_element_type=jnp.float32
    ).astype(oc_ref.dtype)
    od_ref[...] = jnp.dot(
        wd_ref[...], pd_ref[...], preferred_element_type=jnp.float32
    ).astype(od_ref.dtype)


def _tpu_chip_info():
    """Return (vmem_capacity_bytes, multi_tensorcore) with safe fallbacks."""
    vmem_cap = 64 << 20          # conservative fallback (v7x per-TC VMEM)
    multi_tc = False
    try:
        vmem_cap = int(pltpu.get_tpu_info().vmem_capacity_bytes)
    except Exception:
        pass
    try:
        kind = jax.devices()[0].device_kind.lower()
        multi_tc = "v7" in kind            # v7x: 2 TensorCores per chip
    except Exception:
        pass
    return vmem_cap, multi_tc


def _pick_imgs_per_step(n_imgs, bytes_per_img, *, budget, multi_tc):
    """Largest divisor of n_imgs whose double-buffered blocks fit `budget`.

    On multi-TC chips (v7x) prefer >= 2 grid steps so dimension_semantics=
    ("parallel",) can shard the grid across TensorCores; on single-TC chips
    (v5e/v6e) the grid is a serial loop, so fewer steps (ideally 1) is better.
    """
    best = 1
    for d in range(1, n_imgs + 1):
        if n_imgs % d:
            continue
        if 2 * d * bytes_per_img > budget:        # x2: double-buffered pipeline
            continue
        if multi_tc and n_imgs >= 2 and n_imgs // d < 2:
            continue
        best = d
    return best


@jax.jit
def cnp_cnn_encoder_forward(weight, ctx_signal, density):
    """(conv(ctx_signal, |W|), conv(density.expand_as(ctx_signal), |W|))."""
    B, Cin, H, W = ctx_signal.shape
    Cout = weight.shape[0]
    HW = H * W
    KC_CTX = Cin * K * K          # 484
    KC_DEN = K * K                # 121

    # |weight| hoisted out of the kernel.  OIHW -> (Cout, Cin*K*K) matches
    # conv_general_dilated_patches' (c, kh, kw) feature ordering.
    w_abs = jnp.abs(weight)
    w_ctx = w_abs.reshape(Cout, KC_CTX).astype(jnp.bfloat16)
    # Exact identity: conv(density.expand_as(ctx), |W|) == conv(density, sum_c |W|).
    w_den = jnp.sum(w_abs, axis=1).reshape(Cout, KC_DEN).astype(jnp.bfloat16)

    # Wrapper-side im2col.  'SAME' zero padding matches PyTorch padding='same'
    # for odd K, stride 1.  The "CNHW" output spec puts the Cin*K*K feature axis
    # first, so reshaping to (Kc, B*HW) is free (no transpose, no pad copy).
    def patchify(x):
        p = lax.conv_general_dilated_patches(
            x.astype(jnp.bfloat16), (K, K), (1, 1), "SAME",
            dimension_numbers=("NCHW", "OIHW", "CNHW"))
        return p.reshape(p.shape[0], B * HW)

    p_ctx = patchify(ctx_signal)          # (Cin*K*K, B*HW)
    p_den = patchify(density)             # (K*K,     B*HW)   (Cin = 1)

    # Chip-aware images-per-grid-step.
    vmem_cap, multi_tc = _tpu_chip_info()
    per_img = HW * (KC_CTX * 2 + KC_DEN * 2 + 2 * Cout * 4)   # patch + out bytes
    w_bytes = (KC_CTX + KC_DEN) * Cout * 2
    budget = vmem_cap // 2                                    # headroom for Mosaic scratch
    imgs = _pick_imgs_per_step(B, per_img, budget=budget, multi_tc=multi_tc)
    need = 2 * (imgs * per_img + w_bytes)
    # TODO(synk): halo-blocked H tiling (K//2-row halo) once one image's (Kc, HW)
    # block no longer fits VMEM (hits first on v7x's 64 MiB), and in-kernel patch
    # construction from the raw image for very small, launch-bound problems.

    compiler_kwargs = dict(dimension_semantics=("parallel",))
    if need > (16 << 20):        # above the most conservative scoped-VMEM default
        compiler_kwargs["vmem_limit_bytes"] = int(min(vmem_cap, need + (4 << 20)))

    o_ctx, o_den = pl.pallas_call(
        _abs_conv_matmul_kernel,
        out_shape=(jax.ShapeDtypeStruct((Cout, B * HW), jnp.float32),
                   jax.ShapeDtypeStruct((Cout, B * HW), jnp.float32)),
        grid_spec=pltpu.PrefetchScalarGridSpec(
            num_scalar_prefetch=0,
            grid=(B // imgs,),
            in_specs=[
                pl.BlockSpec((Cout, KC_CTX), lambda n: (0, 0)),
                pl.BlockSpec((Cout, KC_DEN), lambda n: (0, 0)),
                pl.BlockSpec((KC_CTX, imgs * HW), lambda n: (0, n)),
                pl.BlockSpec((KC_DEN, imgs * HW), lambda n: (0, n)),
            ],
            out_specs=[
                pl.BlockSpec((Cout, imgs * HW), lambda n: (0, n)),
                pl.BlockSpec((Cout, imgs * HW), lambda n: (0, n)),
            ],
        ),
        compiler_params=pltpu.CompilerParams(**compiler_kwargs),
    )(w_ctx, w_den, p_ctx, p_den)

    # (Cout, B*HW) -> (B, Cout, H, W): small lane-dense output, cheap transpose.
    def to_nchw(o):
        return o.reshape(Cout, B, H, W).transpose(1, 0, 2, 3).astype(ctx_signal.dtype)

    return to_nchw(o_ctx), to_nchw(o_den)


class CNPCNNEncoder:
    """JAX/Pallas port of CNP_CNNEncoder (deterministic synthetic weights)."""

    def __init__(self, n_in_ch: int, n_latent_ch: int, key):
        # Same shape as nn.Conv2d weight: (out_ch, in_ch, 11, 11); Kaiming-uniform-like.
        fan_in = n_in_ch * K * K
        bound = 1.0 / (fan_in ** 0.5)
        self.weight = jax.random.uniform(
            key, (n_latent_ch, n_in_ch, K, K), jnp.float32, -bound, bound)

    def __call__(self, ctx_signal, density):
        return cnp_cnn_encoder_forward(self.weight, ctx_signal, density)


def _reference_conv(x_nchw, w_oihw):
    return lax.conv_general_dilated(
        x_nchw, jnp.abs(w_oihw),
        window_strides=(1, 1), padding="SAME",
        dimension_numbers=("NCHW", "OIHW", "NCHW"),
        precision=lax.Precision.HIGHEST)


if __name__ == "__main__":
    B, C_IN, H, W = 2, 4, 16, 16
    C_LATENT = 32

    key = jax.random.PRNGKey(0)
    k_w, k_ctx, k_den = jax.random.split(key, 3)

    encoder = CNPCNNEncoder(C_IN, C_LATENT, k_w)

    ctx_signal = jax.random.normal(k_ctx, (B, C_IN, H, W), jnp.float32)
    density = jax.random.uniform(k_den, (B, 1, H, W), jnp.float32)

    ctx_out, den_out = encoder(ctx_signal, density)
    jax.block_until_ready((ctx_out, den_out))

    # Cross-check against XLA's conv on the same abs-weights (f32 reference,
    # density explicitly broadcast as in the PyTorch module).
    ref_ctx = _reference_conv(ctx_signal, encoder.weight)
    ref_den = _reference_conv(jnp.broadcast_to(density, ctx_signal.shape), encoder.weight)
    assert ctx_out.shape == (B, C_LATENT, H, W) and den_out.shape == (B, C_LATENT, H, W)
    assert jnp.allclose(ctx_out, ref_ctx, rtol=2e-2, atol=2e-2)
    assert jnp.allclose(den_out, ref_den, rtol=2e-2, atol=2e-2)

    print("KERNEL_OK")
</pallas_src>

<mosaic_0001>
module attributes {stable_mosaic.version = 11 : i64} {
  func.func @_abs_conv_matmul_kernel(%arg0: i32, %arg1: memref<32x484xbf16, #tpu.memory_space<vmem>>, %arg2: memref<32x121xbf16, #tpu.memory_space<vmem>>, %arg3: memref<484x512xbf16, #tpu.memory_space<vmem>>, %arg4: memref<121x512xbf16, #tpu.memory_space<vmem>>, %arg5: memref<32x512xf32, #tpu.memory_space<vmem>>, %arg6: memref<32x512xf32, #tpu.memory_space<vmem>>) attributes {dimension_semantics = [#tpu.dimension_semantics<parallel>], iteration_bounds = array<i64: 1>, scalar_prefetch = 0 : i64, scratch_operands = 0 : i64, tpu.core_type = #tpu.core_type<tc>, window_params = [{pipeline_mode = #tpu.pipeline_mode<synchronous>, transform_indices = @transform_0, window_bounds = array<i64: 32, 484>}, {pipeline_mode = #tpu.pipeline_mode<synchronous>, transform_indices = @transform_1, window_bounds = array<i64: 32, 121>}, {transform_indices = @transform_2, window_bounds = array<i64: 484, 512>}, {transform_indices = @transform_3, window_bounds = array<i64: 121, 512>}, {transform_indices = @transform_4, window_bounds = array<i64: 32, 512>}, {transform_indices = @transform_5, window_bounds = array<i64: 32, 512>}]} {
    %c0 = arith.constant 0 : index
    %c0_0 = arith.constant 0 : index
    %0 = vector.load %arg1[%c0, %c0_0] : memref<32x484xbf16, #tpu.memory_space<vmem>>, vector<32x484xbf16>
    %c0_1 = arith.constant 0 : index
    %c0_2 = arith.constant 0 : index
    %1 = vector.load %arg3[%c0_1, %c0_2] : memref<484x512xbf16, #tpu.memory_space<vmem>>, vector<484x512xbf16>
    %cst = arith.constant dense<0.000000e+00> : vector<32x512xf32>
    %2 = tpu.matmul %0, %1, %cst {dimension_numbers = #tpu.dot_dimension_numbers<[1], [0], [0], [1], [0, 0, 1, 1], [], []>} : vector<32x484xbf16>, vector<484x512xbf16>, vector<32x512xf32> -> vector<32x512xf32>
    %c0_3 = arith.constant 0 : index
    %c0_4 = arith.constant 0 : index
    %3 = vector.load %arg5[%c0_3, %c0_4] : memref<32x512xf32, #tpu.memory_space<vmem>>, vector<32x512xf32>
    tpu.vector_store %arg5[%c0_3, %c0_4], %2 {strides = array<i32>} : memref<32x512xf32, #tpu.memory_space<vmem>>, vector<32x512xf32>,
    %c0_5 = arith.constant 0 : index
    %c0_6 = arith.constant 0 : index
    %4 = vector.load %arg2[%c0_5, %c0_6] : memref<32x121xbf16, #tpu.memory_space<vmem>>, vector<32x121xbf16>
    %c0_7 = arith.constant 0 : index
    %c0_8 = arith.constant 0 : index
    %5 = vector.load %arg4[%c0_7, %c0_8] : memref<121x512xbf16, #tpu.memory_space<vmem>>, vector<121x512xbf16>
    %cst_9 = arith.constant dense<0.000000e+00> : vector<32x512xf32>
    %6 = tpu.matmul %4, %5, %cst_9 {dimension_numbers = #tpu.dot_dimension_numbers<[1], [0], [0], [1], [0, 0, 1, 1], [], []>} : vector<32x121xbf16>, vector<121x512xbf16>, vector<32x512xf32> -> vector<32x512xf32>
    %c0_10 = arith.constant 0 : index
    %c0_11 = arith.constant 0 : index
    %7 = vector.load %arg6[%c0_10, %c0_11] : memref<32x512xf32, #tpu.memory_space<vmem>>, vector<32x512xf32>
    tpu.vector_store %arg6[%c0_10, %c0_11], %6 {strides = array<i32>} : memref<32x512xf32, #tpu.memory_space<vmem>>, vector<32x512xf32>,
    return
  }
  func.func @transform_0(%arg0: i32) -> (i32, i32) {
    %c0_i32 = arith.constant 0 : i32
    %c0_i32_0 = arith.constant 0 : i32
    %c0_i32_1 = arith.constant 0 : i32
    return %c0_i32, %c0_i32_0 : i32, i32
  }
  func.func @transform_1(%arg0: i32) -> (i32, i32) {
    %c0_i32 = arith.constant 0 : i32
    %c0_i32_0 = arith.constant 0 : i32
    %c0_i32_1 = arith.constant 0 : i32
    return %c0_i32, %c0_i32_0 : i32, i32
  }
  func.func @transform_2(%arg0: i32) -> (i32, i32) {
    %c0_i32 = arith.constant 0 : i32
    %c0_i32_0 = arith.constant 0 : i32
    return %c0_i32, %arg0 : i32, i32
  }
  func.func @transform_3(%arg0: i32) -> (i32, i32) {
    %c0_i32 = arith.constant 0 : i32
    %c0_i32_0 = arith.constant 0 : i32
    return %c0_i32, %arg0 : i32, i32
  }
  func.func @transform_4(%arg0: i32) -> (i32, i32) {
    %c0_i32 = arith.constant 0 : i32
    %c0_i32_0 = arith.constant 0 : i32
    return %c0_i32, %arg0 : i32, i32
  }
  func.func @transform_5(%arg0: i32) -> (i32, i32) {
    %c0_i32 = arith.constant 0 : i32
    %c0_i32_0 = arith.constant 0 : i32
    return %c0_i32, %arg0 : i32, i32
  }
}

</mosaic_0001>

<bundles_post_ra>
// kernel: cnp_cnn_encoder_forward.1
= control target key start
LH: loop header
LB: loop body
LE: loop exit
PB: predicated region body
PF: predicated region fallthrough
CT: control target
= control target key end

     0   :  { %vm805_vm0 = vcmask 1041408   ;;  %vm798_vm1 = vcmask 818176   ;;  %vm1347_vm2 = vcmask 1043456   ;;  %vm1348_vm3 = vcmask 1044480   ;;  %s3466_s2 = inlined_call_operand.vmem [shape: bf16[484,512], index: 2, kind: input, shape index: {}]   ;;  %s3467_s0 = inlined_call_operand.vmem [shape: bf16[32,484], index: 0, kind: input, shape index: {}]   ;;  %s3468_s3 = inlined_call_operand.vmem [shape: bf16[121,512], index: 3, kind: input, shape index: {}]   ;;  %s3469_s1 = inlined_call_operand.vmem [shape: bf16[32,121], index: 1, kind: input, shape index: {}]   ;;  %s3470_s4 = inlined_call_operand.vmem [shape: f32[32,512], index: 4, kind: output, shape index: {0}]   ;;  %s3471_s5 = inlined_call_operand.vmem [shape: f32[32,512], index: 5, kind: output, shape index: {1}]  }
   0x1   :  { %v1609_v0 = vld [vmem:[%s3466_s2 + $0xe0] sm:$0xf]  ;;  %v2165_v1 = vld [vmem:[%s3466_s2 + $0xec] sm:$0xf0]  ;;  %vm1340_vm4 = vcmask 990208  }
   0x2   :  { %v1737_v2 = vld [vmem:[%s3466_s2 + $0x1e0] sm:$0xf]  ;;  %v1610_v3 = vor.u32 %v2165_v1, %v1609_v0  ;;  %v2197_v4 = vld [vmem:[%s3466_s2 + $0x1ec] sm:$0xf0] }
   0x3   :  { %v1865_v5 = vld [vmem:[%s3466_s2 + $0x2e0] sm:$0xf]  ;;  %v2229_v6 = vld [vmem:[%s3466_s2 + $0x2ec] sm:$0xf0]  ;;  %v1738_v7 = vor.u32 %v2197_v4, %v1737_v2 }
   0x4   :  { %v1866_v8 = vor.u32 %v2229_v6, %v1865_v5  ;;  %v2342_v9 = vld [vmem:[%s3466_s2 + $0x3c0] sm:$0x33]  ;;  %v2161_v11 = vld [vmem:[%s3466_s2 + $0xcc] sm:$0xf0]  ;;  %818 = vmatpush.bf16.msra.mxu0 %v1610_v3 }
   0x5   :  { %v1593_v10 = vld [vmem:[%s3466_s2 + $0xc0] sm:$0xf]  ;;  %v550_v12 = vunpack.c.l.b16 %v2342_v9  ;;  %v2193_v15 = vld [vmem:[%s3466_s2 + $0x1cc] sm:$0xf0]  ;;  %837 = vmatpush.bf16.msra.mxu1 %v1738_v7 }
   0x6   :  { %v1594_v13 = vor.u32 %v2161_v11, %v1593_v10  ;;  %v1721_v14 = vld [vmem:[%s3466_s2 + $0x1c0] sm:$0xf]  ;;  %856 = vmatpush.bf16.msra.mxu2 %v1866_v8  ;;  %v2225_v18 = vld [vmem:[%s3466_s2 + $0x2cc] sm:$0xf0] }
   0x7   :  { %v1849_v16 = vld [vmem:[%s3466_s2 + $0x2c0] sm:$0xf]  ;;  %v1722_v17 = vor.u32 %v2193_v15, %v1721_v14  ;;  %v2253_v20 = vld [vmem:[%s3466_s2 + $0x3ac] sm:$0xf0]  ;;  %v674_v21 = vpack.c.b16 %v550_v12, %v550_v12 }
   0x8   :  { %v1961_v19 = vld [vmem:[%s3466_s2 + $0x3a0] sm:$0xf]  ;;  %v1850_v22 = vor.u32 %v2225_v18, %v1849_v16  ;;  %v2157_v24 = vld [vmem:[%s3466_s2 + $0xac] sm:$0xf0]  ;;  %819 = vmatpush.bf16.msra.mxu0 %v1594_v13  ;;  %v551_v18 = vunpack.c.h.b16 %v2342_v9 }
   0x9   :  { %v1577_v23 = vld [vmem:[%s3466_s2 + $0xa0] sm:$0xf]  ;;  %v2189_v26 = vld [vmem:[%s3466_s2 + $0x1ac] sm:$0xf0]  ;;  %v807_v29 = vsel %vm805_vm0, %v674_v21, 0  ;;  %838 = vmatpush.bf16.msra.mxu1 %v1722_v17  ;;  %v1962_v31 = vor.u32 %v2253_v20, %v1961_v19 }
   0xa   :  { %v1705_v25 = vld [vmem:[%s3466_s2 + $0x1a0] sm:$0xf]  ;;  %v2221_v28 = vld [vmem:[%s3466_s2 + $0x2ac] sm:$0xf0]  ;;  %v1578_v30 = vor.u32 %v2157_v24, %v1577_v23  ;;  %876 = vmatpush.bf16.msra.mxu3 %v807_v29  ;;  %857 = vmatpush.bf16.msra.mxu2 %v1850_v22  ;;  %v2163_v29 = vld [vmem:[%s3466_s2 + $0xe4] sm:$0xf] }
   0xb   :  { %v1833_v27 = vld [vmem:[%s3466_s2 + $0x2a0] sm:$0xf]  ;;  %v1706_v32 = vor.u32 %v2189_v26, %v1705_v25  ;;  %v2153_v35 = vld [vmem:[%s3466_s2 + $0x8c] sm:$0xf0] }
   0xc   :  { %v1945_v33 = vld [vmem:[%s3466_s2 + $0x380] sm:$0xf]  ;;  %v1834_v36 = vor.u32 %v2221_v28, %v1833_v27  ;;  %v2249_v37 = vld [vmem:[%s3466_s2 + $0x38c] sm:$0xf0]  ;;  %820 = vmatpush.bf16.msra.mxu0 %v1578_v30  ;;  %v2128_v27 = vld [vmem:[%s3467_s0 + $0xc] sm:$0xf] }
   0xd   :  { %v1561_v34 = vld [vmem:[%s3466_s2 + $0x80] sm:$0xf]  ;;  %v2185_v39 = vld [vmem:[%s3466_s2 + $0x18c] sm:$0xf0]  ;;  %839 = vmatpush.bf16.msra.mxu1 %v1706_v32  ;;  %v1946_v43 = vor.u32 %v2249_v37, %v1945_v33  ;;  %v1475_v28 = vld [vmem:[%s3467_s0 + $0x18] sm:$0xf0] }
   0xe   :  { %v1689_v38 = vld [vmem:[%s3466_s2 + $0x180] sm:$0xf]  ;;  %v2217_v41 = vld [vmem:[%s3466_s2 + $0x28c] sm:$0xf0]  ;;  %v1562_v42 = vor.u32 %v2153_v35, %v1561_v34  ;;  %877 = vmatpush.bf16.msra.mxu3 %v1962_v31  ;;  %858 = vmatpush.bf16.msra.mxu2 %v1834_v36  ;;  %v1611_v30 = vld [vmem:[%s3466_s2 + $0xf0] sm:$0xf0]  ;;  %v675_v35 = vpack.c.b16 %v551_v18, %v551_v18 }
   0xf   :  { %v1817_v40 = vld [vmem:[%s3466_s2 + $0x280] sm:$0xf]  ;;  %v1690_v44 = vor.u32 %v2185_v39, %v1689_v38  ;;  %v2149_v47 = vld [vmem:[%s3466_s2 + $0x6c] sm:$0xf0]  ;;  %v2127_v34 = vld [vmem:[%s3467_s0 + $0x4] sm:$0xf] }
  0x10   :  { %v1929_v45 = vld [vmem:[%s3466_s2 + $0x360] sm:$0xf]  ;;  %v1818_v48 = vor.u32 %v2217_v41, %v1817_v40  ;;  %v2245_v49 = vld [vmem:[%s3466_s2 + $0x36c] sm:$0xf0]  ;;  %821 = vmatpush.bf16.msra.mxu0 %v1562_v42  ;;  %v1467_v38 = vld [vmem:[%s3467_s0 + $0x10] sm:$0xf0]  ;;  %v1614_v42 = vor.u32 %v2163_v29, %v1611_v30 }
  0x11   :  { %v1545_v46 = vld [vmem:[%s3466_s2 + $0x60] sm:$0xf]  ;;  %v2181_v51 = vld [vmem:[%s3466_s2 + $0x16c] sm:$0xf0]  ;;  %840 = vmatpush.bf16.msra.mxu1 %v1690_v44  ;;  %v1930_v55 = vor.u32 %v2245_v49, %v1929_v45  ;;  %v1473_v39 = vld [vmem:[%s3467_s0 + $0x8] sm:$0xf] }
  0x12   :  { %v1673_v50 = vld [vmem:[%s3466_s2 + $0x160] sm:$0xf]  ;;  %v2213_v53 = vld [vmem:[%s3466_s2 + $0x26c] sm:$0xf0]  ;;  %v1546_v54 = vor.u32 %v2149_v47, %v1545_v46  ;;  %878 = vmatpush.bf16.msra.mxu3 %v1946_v43  ;;  %859 = vmatpush.bf16.msra.mxu2 %v1818_v48  ;;  %v2130_v40 = vld [vmem:[%s3467_s0 + $0x14] sm:$0xf0] }
  0x13   :  { %v1801_v52 = vld [vmem:[%s3466_s2 + $0x260] sm:$0xf]  ;;  %v1674_v56 = vor.u32 %v2181_v51, %v1673_v50  ;;  %v2145_v59 = vld [vmem:[%s3466_s2 + $0x4c] sm:$0xf0]  ;;  %v2195_v43 = vld [vmem:[%s3466_s2 + $0x1e4] sm:$0xf]  ;;  %v2559_v50 = vor.u32 %v2128_v27, %v1475_v28  ;;  %v2561_v51 = vor.u32 %v2127_v34, %v1467_v38 }
  0x14   :  { %v1913_v57 = vld [vmem:[%s3466_s2 + $0x340] sm:$0xf]  ;;  %v1802_v60 = vor.u32 %v2213_v53, %v1801_v52  ;;  %v2241_v61 = vld [vmem:[%s3466_s2 + $0x34c] sm:$0xf0]  ;;  %822 = vmatpush.bf16.msra.mxu0 %v1546_v54  ;;  %v1739_v44 = vld [vmem:[%s3466_s2 + $0x1f0] sm:$0xf0] }
  0x15   :  { %v1529_v58 = vld [vmem:[%s3466_s2 + $0x40] sm:$0xf]  ;;  %v2177_v63 = vld [vmem:[%s3466_s2 + $0x14c] sm:$0xf0]  ;;  %841 = vmatpush.bf16.msra.mxu1 %v1674_v56  ;;  %v1914_v3 = vor.u32 %v2241_v61, %v1913_v57  ;;  %v2227_v45 = vld [vmem:[%s3466_s2 + $0x2e4] sm:$0xf]  ;;  %v1742_v56 = vor.u32 %v2195_v43, %v1739_v44 }
  0x16   :  { %v1657_v62 = vld [vmem:[%s3466_s2 + $0x140] sm:$0xf]  ;;  %v2209_v1 = vld [vmem:[%s3466_s2 + $0x24c] sm:$0xf0]  ;;  %v1530_v2 = vor.u32 %v2145_v59, %v1529_v58  ;;  %879 = vmatpush.bf16.msra.mxu3 %v1930_v55  ;;  %860 = vmatpush.bf16.msra.mxu2 %v1802_v60  ;;  %v1867_v47 = vld [vmem:[%s3466_s2 + $0x2f0] sm:$0xf0]  ;;  %v2570_v55 = vor.u32 %v2130_v40, %v1473_v39 }
  0x17   :  { %v1785_v0 = vld [vmem:[%s3466_s2 + $0x240] sm:$0xf]  ;;  %v1658_v4 = vor.u32 %v2177_v63, %v1657_v62  ;;  %v2141_v7 = vld [vmem:[%s3466_s2 + $0x2c] sm:$0xf0]  ;;  %v2159_v48 = vld [vmem:[%s3466_s2 + $0xc4] sm:$0xf]  ;;  %v1870_v57 = vor.u32 %v2227_v45, %v1867_v47 }
  0x18   :  { %v1897_v5 = vld [vmem:[%s3466_s2 + $0x320] sm:$0xf]  ;;  %v1786_v8 = vor.u32 %v2209_v1, %v1785_v0  ;;  %v2237_v10 = vld [vmem:[%s3466_s2 + $0x32c] sm:$0xf0]  ;;  %823 = vmatpush.bf16.msra.mxu0 %v1530_v2  ;;  %v1595_v49 = vld [vmem:[%s3466_s2 + $0xd0] sm:$0xf0] }
  0x19   :  { %v1513_v6 = vld [vmem:[%s3466_s2 + $0x20] sm:$0xf]  ;;  %v2173_v12 = vld [vmem:[%s3466_s2 + $0x12c] sm:$0xf0]  ;;  %842 = vmatpush.bf16.msra.mxu1 %v1658_v4  ;;  %v1898_v19 = vor.u32 %v2237_v10, %v1897_v5  ;;  %v810_v52 = vsel %vm805_vm0, %v675_v35, 0  ;;  %v1598_v58 = vor.u32 %v2159_v48, %v1595_v49 }
  0x1a   :  { %v1641_v11 = vld [vmem:[%s3466_s2 + $0x120] sm:$0xf]  ;;  %v2205_v14 = vld [vmem:[%s3466_s2 + $0x22c] sm:$0xf0]  ;;  %v1514_v15 = vor.u32 %v2141_v7, %v1513_v6  ;;  %880 = vmatpush.bf16.msra.mxu3 %v1914_v3  ;;  %861 = vmatpush.bf16.msra.mxu2 %v1786_v8  ;;  %v2251_v53 = vld [vmem:[%s3466_s2 + $0x3a4] sm:$0xf] }
  0x1b   :  { %v1769_v13 = vld [vmem:[%s3466_s2 + $0x220] sm:$0xf]  ;;  %v2233_v17 = vld [vmem:[%s3466_s2 + $0x30c] sm:$0xf0]  ;;  %v1642_v20 = vor.u32 %v2173_v12, %v1641_v11  ;;  %v1963_v54 = vld [vmem:[%s3466_s2 + $0x3b0] sm:$0xf0] }
  0x1c   :  { %v1881_v16 = vld [vmem:[%s3466_s2 + $0x300] sm:$0xf]  ;;  %v2137_v22 = vld [vmem:[%s3466_s2 + $0xc] sm:$0xf0]  ;;  %v1770_v24 = vor.u32 %v2205_v14, %v1769_v13  ;;  %824 = vmatpush.bf16.msra.mxu0 %v1514_v15  ;;  %v2191_v59 = vld [vmem:[%s3466_s2 + $0x1c4] sm:$0xf]  ;;  %v1966_v63 = vor.u32 %v2251_v53, %v1963_v54 }
  0x1d   :  { %v1497_v21 = vld [vmem:[%s3466_s2] sm:$0xf]  ;;  %v2169_v9 = vld [vmem:[%s3466_s2 + $0x10c] sm:$0xf0]  ;;  %843 = vmatpush.bf16.msra.mxu1 %v1642_v20  ;;  %v1882_v36 = vor.u32 %v2233_v17, %v1881_v16  ;;  %v1723_v60 = vld [vmem:[%s3466_s2 + $0x1d0] sm:$0xf0] }
  0x1e   :  { %v1625_v23 = vld [vmem:[%s3466_s2 + $0x100] sm:$0xf]  ;;  %v2201_v26 = vld [vmem:[%s3466_s2 + $0x20c] sm:$0xf0]  ;;  %v1498_v31 = vor.u32 %v2137_v22, %v1497_v21  ;;  %881 = vmatpush.bf16.msra.mxu3 %v1898_v19  ;;  %862 = vmatpush.bf16.msra.mxu2 %v1770_v24  ;;  %v2223_v61 = vld [vmem:[%s3466_s2 + $0x2c4] sm:$0xf]  ;;  %v1726_v4 = vor.u32 %v2191_v59, %v1723_v60 }
  0x1f   :  { %v1753_v25 = vld [vmem:[%s3466_s2 + $0x200] sm:$0xf]  ;;  %v2129_v33 = vld [vmem:[%s3467_s0 + $0xc] sm:$0xf0]  ;;  %v1626_v37 = vor.u32 %v2169_v9, %v1625_v23  ;;  %v1851_v62 = vld [vmem:[%s3466_s2 + $0x2d0] sm:$0xf0] }
  0x20   :  { %v1465_v32 = vld [vmem:[%s3467_s0] sm:$0xf]  ;;  %v1754_v41 = vor.u32 %v2201_v26, %v1753_v25  ;;  %825 = vmatpush.bf16.msra.mxu0 %v1498_v31  ;;  %v2155_v0 = vld [vmem:[%s3466_s2 + $0xa4] sm:$0xf]  ;;  %v1579_v1 = vld [vmem:[%s3466_s2 + $0xb0] sm:$0xf0]  ;;  %v1854_v5 = vor.u32 %v2223_v61, %v1851_v62 }
  0x21   :  { %v2548_v46 = vor.u32 %v2129_v33, %v1465_v32  ;;  %844 = vmatpush.bf16.msra.mxu1 %v1626_v37  ;;  %v2247_v2 = vld [vmem:[%s3466_s2 + $0x384] sm:$0xf]  ;;  %v1947_v3 = vld [vmem:[%s3466_s2 + $0x390] sm:$0xf0]  ;;  %v1582_v6 = vor.u32 %v2155_v0, %v1579_v1  ;;  %v1481_v24 = vld [vmem:[%s3467_s0 + $0x20] sm:$0xf] }
  0x22   :  { %882 = vmatpush.bf16.msra.mxu3 %v1882_v36  ;;  %863 = vmatpush.bf16.msra.mxu2 %v1754_v41  ;;  %v2187_v7 = vld [vmem:[%s3466_s2 + $0x1a4] sm:$0xf]  ;;  %v1707_v8 = vld [vmem:[%s3466_s2 + $0x1b0] sm:$0xf0]  ;;  %v1950_v12 = vor.u32 %v2247_v2, %v1947_v3  ;;  %v2132_v25 = vld [vmem:[%s3467_s0 + $0x2c] sm:$0xf] }
  0x23   :  { %826 = vmatmul.bf16.vlgmr.msra.gmra.mxu0 %v2548_v46  ;;  %v2219_v10 = vld [vmem:[%s3466_s2 + $0x2a4] sm:$0xf]  ;;  %v1835_v11 = vld [vmem:[%s3466_s2 + $0x2b0] sm:$0xf0]  ;;  %v1710_v17 = vor.u32 %v2187_v7, %v1707_v8  ;;  %v1491_v26 = vld [vmem:[%s3467_s0 + $0x38] sm:$0xf0] }
  0x24   :  { %845 = vmatmul.bf16.vlgmr.msra.gmra.mxu1 %v2561_v51  ;;  %913 = vmatpush.bf16.msrb.mxu0 %v1742_v56  ;;  %v2151_v13 = vld [vmem:[%s3466_s2 + $0x84] sm:$0xf]  ;;  %v1563_v14 = vld [vmem:[%s3466_s2 + $0x90] sm:$0xf0]  ;;  %v1838_v20 = vor.u32 %v2219_v10, %v1835_v11  ;;  %v2133_v27 = vld [vmem:[%s3467_s0 + $0x2c] sm:$0xf0]  ;;  %v2693_v48 = vor.u32 %v2132_v25, %v1491_v26 }
  0x25   :  { %1975 = vmatmul.msk.bf16.vlgmr.msra.gmra.mxu3 %vm798_vm1, %v2559_v50  ;;  %864 = vmatmul.bf16.vlgmr.msra.gmra.mxu2 %v2570_v55  ;;  %v2243_v15 = vld [vmem:[%s3466_s2 + $0x364] sm:$0xf]  ;;  %v1931_v16 = vld [vmem:[%s3466_s2 + $0x370] sm:$0xf0]  ;;  %v1566_v21 = vor.u32 %v2151_v13, %v1563_v14  ;;  %v1489_v35 = vld [vmem:[%s3467_s0 + $0x28] sm:$0xf] }
  0x26   :  { %894 = vmatpush.bf16.msrb.mxu3 %v1614_v42  ;;  %952 = vmatpush.bf16.msrb.mxu2 %v810_v52  ;;  %v2183_v18 = vld [vmem:[%s3466_s2 + $0x184] sm:$0xf]  ;;  %v1691_v19 = vld [vmem:[%s3466_s2 + $0x190] sm:$0xf0]  ;;  %v1934_v9 = vor.u32 %v2243_v15, %v1931_v16  ;;  %v2134_v36 = vld [vmem:[%s3467_s0 + $0x34] sm:$0xf0]  ;;  %v2682_v42 = vor.u32 %v2133_v27, %v1481_v24 }
  0x27   :  { %932 = vmatpush.bf16.msrb.mxu1 %v1870_v57  ;;  %v2215_v22 = vld [vmem:[%s3466_s2 + $0x284] sm:$0xf]  ;;  %v1819_v23 = vld [vmem:[%s3466_s2 + $0x290] sm:$0xf0]  ;;  %v1694_v33 = vor.u32 %v2183_v18, %v1691_v19  ;;  %v2706_v54 = vld [vmem:[%s3466_s2 + $0x3c8] sm:$0x33]  ;;  %v2708_v56 = vor.u32 %v2134_v36, %v1489_v35 }
  0x28   :  { %914 = vmatpush.bf16.msrb.mxu0 %v1726_v4  ;;  %v2147_v28 = vld [vmem:[%s3466_s2 + $0x64] sm:$0xf]  ;;  %v1547_v29 = vld [vmem:[%s3466_s2 + $0x70] sm:$0xf0]  ;;  %v1822_v37 = vor.u32 %v2215_v22, %v1819_v23  ;;  %v1617_v19 = vld [vmem:[%s3466_s2 + $0xe8] sm:$0xf] }
  0x29   :  { %v2131_v30 = vld [vmem:[%s3467_s0 + $0x24] sm:$0xf]  ;;  %v1915_v32 = vld [vmem:[%s3466_s2 + $0x350] sm:$0xf0]  ;;  %v1550_v38 = vor.u32 %v2147_v28, %v1547_v29  ;;  %v1969_v23 = vld [vmem:[%s3466_s2 + $0x3a8] sm:$0xf] }
  0x2a   :  { %895 = vmatpush.bf16.msrb.mxu3 %v1598_v58  ;;  %953 = vmatpush.bf16.msrb.mxu2 %v1966_v63  ;;  %v2239_v31 = vld [vmem:[%s3466_s2 + $0x344] sm:$0xf]  ;;  %v1483_v34 = vld [vmem:[%s3467_s0 + $0x30] sm:$0xf0]  ;;  %v552_v58 = vunpack.c.l.b16 %v2706_v54  ;;  %v2254_v24 = vld [vmem:[%s3466_s2 + $0x3b4] sm:$0xf0] }
  0x2b   :  { %933 = vmatpush.bf16.msrb.mxu1 %v1854_v5  ;;  %v2179_v39 = vld [vmem:[%s3466_s2 + $0x164] sm:$0xf]  ;;  %v1675_v40 = vld [vmem:[%s3466_s2 + $0x170] sm:$0xf0]  ;;  %v1918_v44 = vor.u32 %v2239_v31, %v1915_v32  ;;  %v2695_v49 = vor.u32 %v2131_v30, %v1483_v34  ;;  %v1745_v30 = vld [vmem:[%s3466_s2 + $0x1e8] sm:$0xf]  ;;  %v1970_v36 = vor.u32 %v2254_v24, %v1969_v23 }
  0x2c   :  { %915 = vmatpush.bf16.msrb.mxu0 %v1710_v17  ;;  %v2211_v41 = vld [vmem:[%s3466_s2 + $0x264] sm:$0xf]  ;;  %v1803_v43 = vld [vmem:[%s3466_s2 + $0x270] sm:$0xf0]  ;;  %v1678_v57 = vor.u32 %v2179_v39, %v1675_v40  ;;  %v676_v7 = vpack.c.b16 %v552_v58, %v552_v58  ;;  %v2198_v31 = vld [vmem:[%s3466_s2 + $0x1f4] sm:$0xf0] }
  0x2d   :  { %v2143_v45 = vld [vmem:[%s3466_s2 + $0x44] sm:$0xf]  ;;  %v1531_v47 = vld [vmem:[%s3466_s2 + $0x50] sm:$0xf0]  ;;  %v1806_v59 = vor.u32 %v2211_v41, %v1803_v43  ;;  %v1873_v32 = vld [vmem:[%s3466_s2 + $0x2e8] sm:$0xf]  ;;  %v1746_v39 = vor.u32 %v2198_v31, %v1745_v30  ;;  %v553_v31 = vunpack.c.h.b16 %v2706_v54 }
  0x2e   :  { %896 = vmatpush.bf16.msrb.mxu3 %v1582_v6  ;;  %954 = vmatpush.bf16.msrb.mxu2 %v1950_v12  ;;  %v2235_v52 = vld [vmem:[%s3466_s2 + $0x324] sm:$0xf]  ;;  %v1899_v53 = vld [vmem:[%s3466_s2 + $0x330] sm:$0xf0]  ;;  %v1534_v60 = vor.u32 %v2143_v45, %v1531_v47  ;;  %v813_v22 = vsel %vm805_vm0, %v676_v7, 0 }
  0x2f   :  { %934 = vmatpush.bf16.msrb.mxu1 %v1838_v20  ;;  %v2175_v61 = vld [vmem:[%s3466_s2 + $0x144] sm:$0xf]  ;;  %v1659_v62 = vld [vmem:[%s3466_s2 + $0x150] sm:$0xf0]  ;;  %v1902_v1 = vor.u32 %v2235_v52, %v1899_v53  ;;  %v2166_v20 = vld [vmem:[%s3466_s2 + $0xf4] sm:$0xf0] }
  0x30   :  { %916 = vmatpush.bf16.msrb.mxu0 %v1694_v33  ;;  %v2207_v63 = vld [vmem:[%s3466_s2 + $0x244] sm:$0xf]  ;;  %v1787_v0 = vld [vmem:[%s3466_s2 + $0x250] sm:$0xf0]  ;;  %v1662_v6 = vor.u32 %v2175_v61, %v1659_v62  ;;  %v1618_v29 = vor.u32 %v2166_v20, %v1617_v19  ;;  %v2230_v33 = vld [vmem:[%s3466_s2 + $0x2f4] sm:$0xf0] }
  0x31   :  { %v2139_v2 = vld [vmem:[%s3466_s2 + $0x24] sm:$0xf]  ;;  %v1515_v3 = vld [vmem:[%s3466_s2 + $0x30] sm:$0xf0]  ;;  %v1790_v8 = vor.u32 %v2207_v63, %v1787_v0  ;;  %v1601_v34 = vld [vmem:[%s3466_s2 + $0xc8] sm:$0xf]  ;;  %v1874_v43 = vor.u32 %v2230_v33, %v1873_v32 }
  0x32   :  { %897 = vmatpush.bf16.msrb.mxu3 %v1566_v21  ;;  %955 = vmatpush.bf16.msrb.mxu2 %v1934_v9  ;;  %v2231_v4 = vld [vmem:[%s3466_s2 + $0x304] sm:$0xf]  ;;  %v1883_v5 = vld [vmem:[%s3466_s2 + $0x310] sm:$0xf0]  ;;  %v1518_v10 = vor.u32 %v2139_v2, %v1515_v3  ;;  %v2162_v35 = vld [vmem:[%s3466_s2 + $0xd4] sm:$0xf0] }
  0x33   :  { %935 = vmatpush.bf16.msrb.mxu1 %v1822_v37  ;;  %831 = vmatmul.bf16.gmra.mxu0 %v2682_v42  ;;  %v2171_v11 = vld [vmem:[%s3466_s2 + $0x124] sm:$0xf]  ;;  %v1643_v12 = vld [vmem:[%s3466_s2 + $0x130] sm:$0xf0]  ;;  %v1886_v17 = vor.u32 %v2231_v4, %v1883_v5  ;;  %v1729_v40 = vld [vmem:[%s3466_s2 + $0x1c8] sm:$0xf] }
  0x34   :  { %850 = vmatmul.bf16.gmra.mxu1 %v2695_v49  ;;  %917 = vmatpush.bf16.msrb.mxu0 %v1678_v57  ;;  %v2203_v13 = vld [vmem:[%s3466_s2 + $0x224] sm:$0xf]  ;;  %v1771_v14 = vld [vmem:[%s3466_s2 + $0x230] sm:$0xf0]  ;;  %v1646_v21 = vor.u32 %v2171_v11, %v1643_v12  ;;  %v2194_v41 = vld [vmem:[%s3466_s2 + $0x1d4] sm:$0xf0] }
  0x35   :  { %1976 = vmatmul.msk.bf16.gmra.mxu3 %vm798_vm1, %v2693_v48  ;;  %869 = vmatmul.bf16.gmra.mxu2 %v2708_v56  ;;  %v2135_v15 = vld [vmem:[%s3466_s2 + $0x4] sm:$0xf]  ;;  %v1499_v16 = vld [vmem:[%s3466_s2 + $0x10] sm:$0xf0]  ;;  %v1774_v9 = vor.u32 %v2203_v13, %v1771_v14  ;;  %v1857_v45 = vld [vmem:[%s3466_s2 + $0x2c8] sm:$0xf] }
  0x36   :  { %898 = vmatpush.bf16.msrb.mxu3 %v1550_v38  ;;  %956 = vmatpush.bf16.msrb.mxu2 %v1918_v44  ;;  %v2167_v18 = vld [vmem:[%s3466_s2 + $0x104] sm:$0xf]  ;;  %v1502_v25 = vor.u32 %v2135_v15, %v1499_v16  ;;  %v1627_v26 = vld [vmem:[%s3466_s2 + $0x110] sm:$0xf0]  ;;  %v1602_v44 = vor.u32 %v2162_v35, %v1601_v34  ;;  %v1953_v47 = vld [vmem:[%s3466_s2 + $0x388] sm:$0xf] }
  0x37   :  { %936 = vmatpush.bf16.msrb.mxu1 %v1806_v59  ;;  %v2199_v27 = vld [vmem:[%s3466_s2 + $0x204] sm:$0xf]  ;;  %v1755_v28 = vld [vmem:[%s3466_s2 + $0x210] sm:$0xf0]  ;;  %v1630_v37 = vor.u32 %v2167_v18, %v1627_v26  ;;  %v2250_v52 = vld [vmem:[%s3466_s2 + $0x394] sm:$0xf0]  ;;  %v1730_v59 = vor.u32 %v2194_v41, %v1729_v40 }
  0x38   :  { %918 = vmatpush.bf16.msrb.mxu0 %v1662_v6  ;;  %v1758_v38 = vor.u32 %v2199_v27, %v1755_v28  ;;  %v2226_v53 = vld [vmem:[%s3466_s2 + $0x2d4] sm:$0xf0]  ;;  %v1585_v57 = vld [vmem:[%s3466_s2 + $0xa8] sm:$0xf]  ;;  %v1954_v62 = vor.u32 %v2250_v52, %v1953_v47 }
  0x39   :  { %v2158_v58 = vld [vmem:[%s3466_s2 + $0xb4] sm:$0xf0]  ;;  %v1858_v63 = vor.u32 %v2226_v53, %v1857_v45  ;;  %v1937_v2 = vld [vmem:[%s3466_s2 + $0x368] sm:$0xf] }
  0x3a   :  { %899 = vmatpush.bf16.msrb.mxu3 %v1534_v60  ;;  %957 = vmatpush.bf16.msrb.mxu2 %v1902_v1  ;;  %v1713_v60 = vld [vmem:[%s3466_s2 + $0x1a8] sm:$0xf]  ;;  %v2190_v61 = vld [vmem:[%s3466_s2 + $0x1b4] sm:$0xf0]  ;;  %v1586_v0 = vor.u32 %v2158_v58, %v1585_v57 }
  0x3b   :  { %937 = vmatpush.bf16.msrb.mxu1 %v1790_v8  ;;  %v1841_v1 = vld [vmem:[%s3466_s2 + $0x2a8] sm:$0xf]  ;;  %v2246_v3 = vld [vmem:[%s3466_s2 + $0x374] sm:$0xf0]  ;;  %v1714_v7 = vor.u32 %v2190_v61, %v1713_v60 }
  0x3c   :  { %919 = vmatpush.bf16.msrb.mxu0 %v1646_v21  ;;  %v2222_v4 = vld [vmem:[%s3466_s2 + $0x2b4] sm:$0xf0]  ;;  %v1569_v5 = vld [vmem:[%s3466_s2 + $0x88] sm:$0xf]  ;;  %v1938_v11 = vor.u32 %v2246_v3, %v1937_v2  ;;  %v2252_v2 = vld [vmem:[%s3466_s2 + $0x3ac] sm:$0xf] }
  0x3d   :  { %v2154_v6 = vld [vmem:[%s3466_s2 + $0x94] sm:$0xf0]  ;;  %v1697_v8 = vld [vmem:[%s3466_s2 + $0x188] sm:$0xf]  ;;  %v1842_v12 = vor.u32 %v2222_v4, %v1841_v1  ;;  %v1971_v3 = vld [vmem:[%s3466_s2 + $0x3b8] sm:$0xf0] }
  0x3e   :  { %900 = vmatpush.bf16.msrb.mxu3 %v1518_v10  ;;  %958 = vmatpush.bf16.msrb.mxu2 %v1886_v17  ;;  %v2186_v10 = vld [vmem:[%s3466_s2 + $0x194] sm:$0xf0]  ;;  %v1570_v13 = vor.u32 %v2154_v6, %v1569_v5  ;;  %v1825_v14 = vld [vmem:[%s3466_s2 + $0x288] sm:$0xf] }
  0x3f   :  { %938 = vmatpush.bf16.msrb.mxu1 %v1774_v9  ;;  %v1921_v15 = vld [vmem:[%s3466_s2 + $0x348] sm:$0xf]  ;;  %v2242_v16 = vld [vmem:[%s3466_s2 + $0x354] sm:$0xf0]  ;;  %v1698_v20 = vor.u32 %v2186_v10, %v1697_v8 }
  0x40   :  { %920 = vmatpush.bf16.msrb.mxu0 %v1630_v37  ;;  %v2218_v17 = vld [vmem:[%s3466_s2 + $0x294] sm:$0xf0]  ;;  %v1553_v18 = vld [vmem:[%s3466_s2 + $0x68] sm:$0xf]  ;;  %v1922_v23 = vor.u32 %v2242_v16, %v1921_v15  ;;  %v2228_v15 = vld [vmem:[%s3466_s2 + $0x2ec] sm:$0xf]  ;;  %v1974_v16 = vor.u32 %v2252_v2, %v1971_v3 }
  0x41   :  { %v2150_v19 = vld [vmem:[%s3466_s2 + $0x74] sm:$0xf0]  ;;  %v1681_v21 = vld [vmem:[%s3466_s2 + $0x168] sm:$0xf]  ;;  %v1826_v24 = vor.u32 %v2218_v17, %v1825_v14  ;;  %v1747_v14 = vld [vmem:[%s3466_s2 + $0x1f8] sm:$0xf0] }
  0x42   :  { %1028 = vmatpush.bf16.msra.mxu2 %v813_v22  ;;  %901 = vmatpush.bf16.msrb.mxu3 %v1502_v25  ;;  %v2182_v22 = vld [vmem:[%s3466_s2 + $0x174] sm:$0xf0]  ;;  %v1554_v9 = vor.u32 %v2150_v19, %v1553_v18  ;;  %v1809_v25 = vld [vmem:[%s3466_s2 + $0x268] sm:$0xf]  ;;  %v1875_v17 = vld [vmem:[%s3466_s2 + $0x2f8] sm:$0xf0] }
  0x43   :  { %939 = vmatpush.bf16.msrb.mxu1 %v1758_v38  ;;  %921 = vmatmul.bf16.vlgmr.msrb.gmra.mxu0 %v2561_v51  ;;  %v1905_v26 = vld [vmem:[%s3466_s2 + $0x328] sm:$0xf]  ;;  %v2238_v27 = vld [vmem:[%s3466_s2 + $0x334] sm:$0xf0]  ;;  %v1682_v32 = vor.u32 %v2182_v22, %v1681_v21  ;;  %v2160_v18 = vld [vmem:[%s3466_s2 + $0xcc] sm:$0xf] }
  0x44   :  { %989 = vmatpush.bf16.msra.mxu0 %v1746_v39  ;;  %v2214_v28 = vld [vmem:[%s3466_s2 + $0x274] sm:$0xf0]  ;;  %v1665_v33 = vld [vmem:[%s3466_s2 + $0x148] sm:$0xf]  ;;  %v1906_v35 = vor.u32 %v2238_v27, %v1905_v26  ;;  %v1603_v19 = vld [vmem:[%s3466_s2 + $0xd8] sm:$0xf0] }
  0x45   :  { %902 = vmatmul.bf16.vlgmr.msrb.gmra.mxu3 %v2548_v46  ;;  %1977 = vmatmul.msk.bf16.vlgmr.msrb.gmra.mxu2 %vm798_vm1, %v2559_v50  ;;  %v2146_v30 = vld [vmem:[%s3466_s2 + $0x54] sm:$0xf0]  ;;  %v1793_v54 = vld [vmem:[%s3466_s2 + $0x248] sm:$0xf]  ;;  %v2248_v21 = vld [vmem:[%s3466_s2 + $0x38c] sm:$0xf] }
  0x46   :  { %970 = vmatpush.bf16.msra.mxu3 %v1618_v29  ;;  %1029 = vmatpush.bf16.msra.mxu2 %v1970_v36  ;;  %v1537_v29 = vld [vmem:[%s3466_s2 + $0x48] sm:$0xf]  ;;  %v2178_v34 = vld [vmem:[%s3466_s2 + $0x154] sm:$0xf0]  ;;  %v1810_v36 = vor.u32 %v2214_v28, %v1809_v25  ;;  %v1955_v22 = vld [vmem:[%s3466_s2 + $0x398] sm:$0xf0]  ;;  %v1606_v25 = vor.u32 %v2160_v18, %v1603_v19 }
  0x47   :  { %1008 = vmatpush.bf16.msra.mxu1 %v1874_v43  ;;  %v1538_v37 = vor.u32 %v2146_v30, %v1537_v29  ;;  %v1889_v38 = vld [vmem:[%s3466_s2 + $0x308] sm:$0xf]  ;;  %v2234_v39 = vld [vmem:[%s3466_s2 + $0x314] sm:$0xf0]  ;;  %v1666_v45 = vor.u32 %v2178_v34, %v1665_v33  ;;  %v2192_v26 = vld [vmem:[%s3466_s2 + $0x1cc] sm:$0xf]  ;;  %v1958_v28 = vor.u32 %v2248_v21, %v1955_v22 }
  0x48   :  { %940 = vmatmul.bf16.vlgmr.msrb.gmra.mxu1 %v2570_v55  ;;  %990 = vmatpush.bf16.msra.mxu0 %v1730_v59  ;;  %v2210_v40 = vld [vmem:[%s3466_s2 + $0x254] sm:$0xf0]  ;;  %v1521_v41 = vld [vmem:[%s3466_s2 + $0x28] sm:$0xf]  ;;  %v1890_v53 = vor.u32 %v2234_v39, %v1889_v38  ;;  %v1731_v27 = vld [vmem:[%s3466_s2 + $0x1d8] sm:$0xf0] }
  0x49   :  { %v2142_v43 = vld [vmem:[%s3466_s2 + $0x34] sm:$0xf0]  ;;  %v1649_v47 = vld [vmem:[%s3466_s2 + $0x128] sm:$0xf]  ;;  %v1794_v57 = vor.u32 %v2210_v40, %v1793_v54  ;;  %v2224_v29 = vld [vmem:[%s3466_s2 + $0x2cc] sm:$0xf] }
  0x4a   :  { %971 = vmatpush.bf16.msra.mxu3 %v1602_v44  ;;  %1030 = vmatpush.bf16.msra.mxu2 %v1954_v62  ;;  %v677_v44 = vpack.c.b16 %v553_v31, %v553_v31  ;;  %v2174_v52 = vld [vmem:[%s3466_s2 + $0x134] sm:$0xf0]  ;;  %v1522_v58 = vor.u32 %v2142_v43, %v1521_v41  ;;  %v1777_v59 = vld [vmem:[%s3466_s2 + $0x228] sm:$0xf]  ;;  %v1859_v30 = vld [vmem:[%s3466_s2 + $0x2d8] sm:$0xf0]  ;;  %v1734_v31 = vor.u32 %v2192_v26, %v1731_v27 }
  0x4b   :  { %1009 = vmatpush.bf16.msra.mxu1 %v1858_v63  ;;  %v2206_v60 = vld [vmem:[%s3466_s2 + $0x234] sm:$0xf0]  ;;  %v1505_v61 = vld [vmem:[%s3466_s2 + $0x8] sm:$0xf]  ;;  %v2164_v63 = vld [vmem:[%s3466_s2 + $0xec] sm:$0xf]  ;;  %v1650_v4 = vor.u32 %v2174_v52, %v1649_v47  ;;  %v1862_v54 = vor.u32 %v2224_v29, %v1859_v30 }
  0x4c   :  { %991 = vmatpush.bf16.msra.mxu0 %v1714_v7  ;;  %v2138_v62 = vld [vmem:[%s3466_s2 + $0x14] sm:$0xf0]  ;;  %v816_v1 = vsel %vm805_vm0, %v677_v44, 0  ;;  %v1633_v5 = vld [vmem:[%s3466_s2 + $0x108] sm:$0xf]  ;;  %v1778_v6 = vor.u32 %v2206_v60, %v1777_v59  ;;  %v2290_v21 = vmov 65535  }
  0x4d   :  { %v1506_v7 = vor.u32 %v2138_v62, %v1505_v61  ;;  %v2170_v8 = vld [vmem:[%s3466_s2 + $0x114] sm:$0xf0]  ;;  %v1761_v10 = vld [vmem:[%s3466_s2 + $0x208] sm:$0xf]  ;;  %v1587_v33 = vld [vmem:[%s3466_s2 + $0xb8] sm:$0xf0] }
  0x4e   :  { %972 = vmatpush.bf16.msra.mxu3 %v1586_v0  ;;  %1031 = vmatpush.bf16.msra.mxu2 %v1938_v11  ;;  %v1619_v0 = vld [vmem:[%s3466_s2 + $0xf8] sm:$0xf0]  ;;  %v2202_v11 = vld [vmem:[%s3466_s2 + $0x214] sm:$0xf0]  ;;  %v2188_v34 = vld [vmem:[%s3466_s2 + $0x1ac] sm:$0xf] }
  0x4f   :  { %1010 = vmatpush.bf16.msra.mxu1 %v1842_v12  ;;  %v1622_v12 = vor.u32 %v2164_v63, %v1619_v0  ;;  %v2220_v39 = vld [vmem:[%s3466_s2 + $0x2ac] sm:$0xf]  ;;  %v1843_v40 = vld [vmem:[%s3466_s2 + $0x2b8] sm:$0xf0]  ;;  %v1349_v22 = vsel %vm1347_vm2, 4294967295, %v2290_v21 }
  0x50   :  { %992 = vmatpush.bf16.msra.mxu0 %v1698_v20  ;;  %v1634_v20 = vor.u32 %v2170_v8, %v1633_v5  ;;  %v2152_v43 = vld [vmem:[%s3466_s2 + $0x8c] sm:$0xf]  ;;  %v1571_v44 = vld [vmem:[%s3466_s2 + $0x98] sm:$0xf0]  ;;  %v2279_v21 = vld [vmem:[%s3468_s3 + $0xac] sm:$0xf0] }
  0x51   :  { %v1699_v52 = vld [vmem:[%s3466_s2 + $0x198] sm:$0xf0]  ;;  %v1574_v59 = vor.u32 %v2152_v43, %v1571_v44  ;;  %v2216_v60 = vld [vmem:[%s3466_s2 + $0x28c] sm:$0xf] }
  0x52   :  { %973 = vmatpush.bf16.msra.mxu3 %v1570_v13  ;;  %1032 = vmatpush.bf16.msra.mxu2 %v1922_v23  ;;  %v2196_v13 = vld [vmem:[%s3466_s2 + $0x1ec] sm:$0xf]  ;;  %v1762_v23 = vor.u32 %v2202_v11, %v1761_v10  ;;  %v1827_v61 = vld [vmem:[%s3466_s2 + $0x298] sm:$0xf0] }
  0x53   :  { %1011 = vmatpush.bf16.msra.mxu1 %v1826_v24  ;;  %926 = vmatmul.bf16.gmra.mxu0 %v2695_v49  ;;  %v1750_v24 = vor.u32 %v2196_v13, %v1747_v14  ;;  %v2148_v63 = vld [vmem:[%s3466_s2 + $0x6c] sm:$0xf]  ;;  %v1555_v0 = vld [vmem:[%s3466_s2 + $0x78] sm:$0xf0]  ;;  %v1830_v8 = vor.u32 %v2216_v60, %v1827_v61 }
  0x54   :  { %993 = vmatpush.bf16.msra.mxu0 %v1682_v32  ;;  %v2156_v32 = vld [vmem:[%s3466_s2 + $0xac] sm:$0xf]  ;;  %v1683_v3 = vld [vmem:[%s3466_s2 + $0x178] sm:$0xf0]  ;;  %v1558_v10 = vor.u32 %v2148_v63, %v1555_v0 }
  0x55   :  { %907 = vmatmul.bf16.gmra.mxu3 %v2682_v42  ;;  %1978 = vmatmul.msk.bf16.gmra.mxu2 %vm798_vm1, %v2693_v48  ;;  %v1590_v38 = vor.u32 %v2156_v32, %v1587_v33  ;;  %v1907_v5 = vld [vmem:[%s3466_s2 + $0x338] sm:$0xf0]  ;;  %v2144_v11 = vld [vmem:[%s3466_s2 + $0x4c] sm:$0xf]  ;;  %v2105_v33 = vld [vmem:[%s3468_s3 + $0xe0] sm:$0xf] }
  0x56   :  { %974 = vmatpush.bf16.msra.mxu3 %v1554_v9  ;;  %1033 = vmatpush.bf16.msra.mxu2 %v1906_v35  ;;  %v1878_v9 = vor.u32 %v2228_v15, %v1875_v17  ;;  %v1715_v35 = vld [vmem:[%s3466_s2 + $0x1b8] sm:$0xf0]  ;;  %v2176_v14 = vld [vmem:[%s3466_s2 + $0x14c] sm:$0xf] }
  0x57   :  { %1012 = vmatpush.bf16.msra.mxu1 %v1810_v36  ;;  %v2244_v36 = vld [vmem:[%s3466_s2 + $0x36c] sm:$0xf]  ;;  %v1718_v41 = vor.u32 %v2188_v34, %v1715_v35  ;;  %v1667_v15 = vld [vmem:[%s3466_s2 + $0x158] sm:$0xf0]  ;;  %v2287_v34 = vld [vmem:[%s3468_s3 + $0xec] sm:$0x10] }
  0x58   :  { %945 = vmatmul.bf16.gmra.mxu1 %v2708_v56  ;;  %994 = vmatpush.bf16.msra.mxu0 %v1666_v45  ;;  %v2184_v45 = vld [vmem:[%s3466_s2 + $0x18c] sm:$0xf]  ;;  %v1891_v18 = vld [vmem:[%s3466_s2 + $0x318] sm:$0xf0]  ;;  %v1670_v27 = vor.u32 %v2176_v14, %v1667_v15  ;;  %v1350_v35 = vsel %vm1348_vm3, %v1349_v22, 0 }
  0x59   :  { %v1702_v62 = vor.u32 %v2184_v45, %v1699_v52  ;;  %v2232_v17 = vld [vmem:[%s3466_s2 + $0x30c] sm:$0xf]  ;;  %v1651_v30 = vld [vmem:[%s3466_s2 + $0x138] sm:$0xf0] }
  0x5a   :  { %975 = vmatpush.bf16.msra.mxu3 %v1538_v37  ;;  %1034 = vmatpush.bf16.msra.mxu2 %v1890_v53  ;;  %v1939_v37 = vld [vmem:[%s3466_s2 + $0x378] sm:$0xf0]  ;;  %v2240_v53 = vld [vmem:[%s3466_s2 + $0x34c] sm:$0xf] }
  0x5b   :  { %1013 = vmatpush.bf16.msra.mxu1 %v1794_v57  ;;  %v1942_v47 = vor.u32 %v2244_v36, %v1939_v37  ;;  %v1923_v57 = vld [vmem:[%s3466_s2 + $0x358] sm:$0xf0]  ;;  %v2286_v19 = vld [vmem:[%s3468_s3 + $0xec] sm:$0xf]  ;;  %v2285_v36 = vld [vmem:[%s3468_s3 + $0xe4] sm:$0xf] }
  0x5c   :  { %995 = vmatpush.bf16.msra.mxu0 %v1650_v4  ;;  %v1926_v2 = vor.u32 %v2240_v53, %v1923_v57  ;;  %v2236_v4 = vld [vmem:[%s3466_s2 + $0x32c] sm:$0xf]  ;;  %v2107_v37 = vld [vmem:[%s3468_s3 + $0xf0] sm:$0x10]  ;;  %v1507_v44 = vld [vmem:[%s3466_s2 + $0x18] sm:$0xf0] }
  0x5d   :  { %v2140_v26 = vld [vmem:[%s3466_s2 + $0x2c] sm:$0xf]  ;;  %v1635_v53 = vld [vmem:[%s3466_s2 + $0x118] sm:$0xf0]  ;;  %v2110_v57 = vor.u32 %v2285_v36, %v2107_v37 }
  0x5e   :  { %976 = vmatpush.bf16.msra.mxu3 %v1522_v58  ;;  %1104 = vmatpush.bf16.msrb.mxu2 %v816_v1  ;;  %v1846_v58 = vor.u32 %v2220_v39, %v1843_v40  ;;  %v2180_v1 = vld [vmem:[%s3466_s2 + $0x16c] sm:$0xf]  ;;  %v1779_v40 = vld [vmem:[%s3466_s2 + $0x238] sm:$0xf0] }
  0x5f   :  { %1014 = vmatpush.bf16.msra.mxu1 %v1778_v6  ;;  %v2212_v6 = vld [vmem:[%s3466_s2 + $0x26c] sm:$0xf]  ;;  %v1686_v13 = vor.u32 %v2180_v1, %v1683_v3  ;;  %v2099_v61 = vld [vmem:[%s3468_s3 + $0xd8] sm:$0xf0] }
  0x60   :  { %996 = vmatpush.bf16.msra.mxu0 %v1634_v20  ;;  %v2115_v20 = vld [vmem:[%s3468_s3 + $0xf8] sm:$0x10]  ;;  %v2172_v29 = vld [vmem:[%s3466_s2 + $0x12c] sm:$0xf] }
  0x61   :  { %v2118_v32 = vor.u32 %v2286_v19, %v2115_v20  ;;  %v2204_v39 = vld [vmem:[%s3466_s2 + $0x22c] sm:$0xf]  ;;  %v2284_v19 = vld [vmem:[%s3468_s3 + $0xd4] sm:$0xf0]  ;;  %v2073_v20 = vld [vmem:[%s3468_s3 + $0xa0] sm:$0xf] }
  0x62   :  { %977 = vmatpush.bf16.msra.mxu3 %v1506_v7  ;;  %1105 = vmatpush.bf16.msrb.mxu2 %v1974_v16  ;;  %v1811_v7 = vld [vmem:[%s3466_s2 + $0x278] sm:$0xf0]  ;;  %v1910_v16 = vor.u32 %v2236_v4, %v1907_v5  ;;  %v2136_v43 = vld [vmem:[%s3466_s2 + $0xc] sm:$0xf]  ;;  %v1355_v5 = vand.u32 %v2110_v57, %v1350_v35  ;;  %v2272_v57 = vld [vmem:[%s3468_s3 + $0x74] sm:$0xf0] }
  0x63   :  { %1015 = vmatpush.bf16.msra.mxu1 %v1762_v23  ;;  %997 = vmatmul.bf16.vlgmr.msra.gmra.mxu0 %v2561_v51  ;;  %v1814_v23 = vor.u32 %v2212_v6, %v1811_v7  ;;  %v2168_v45 = vld [vmem:[%s3466_s2 + $0x10c] sm:$0xf]  ;;  %v1361_v52 = vand.u32 %v2118_v32, %v1350_v35  ;;  %v1510_v63 = vor.u32 %v2136_v43, %v1507_v44  ;;  %v2089_v6 = vld [vmem:[%s3468_s3 + $0xc0] sm:$0xf]  ;;  %v2283_v7 = vld [vmem:[%s3468_s3 + $0xcc] sm:$0xf0] }
  0x64   :  { %1065 = vmatpush.bf16.msrb.mxu0 %v1750_v24  ;;  %v2282_v60 = vld [vmem:[%s3468_s3 + $0xcc] sm:$0xf]  ;;  %v1638_v0 = vor.u32 %v2168_v45, %v1635_v53  ;;  %v2271_v43 = vld [vmem:[%s3468_s3 + $0x6c] sm:$0xf0]  ;;  %v2269_v44 = vld [vmem:[%s3468_s3 + $0x64] sm:$0xf] }
  0x65   :  { %978 = vmatmul.bf16.vlgmr.msra.gmra.mxu3 %v2548_v46  ;;  %1979 = vmatmul.msk.bf16.vlgmr.msra.gmra.mxu2 %vm798_vm1, %v2559_v50  ;;  %v2200_v1 = vld [vmem:[%s3466_s2 + $0x20c] sm:$0xf]  ;;  %v2043_v45 = vld [vmem:[%s3468_s3 + $0x70] sm:$0xf0]  ;;  %v2035_v53 = vld [vmem:[%s3468_s3 + $0x58] sm:$0xf0] }
  0x66   :  { %1046 = vmatpush.bf16.msrb.mxu3 %v1622_v12  ;;  %1106 = vmatpush.bf16.msrb.mxu2 %v1958_v28  ;;  %v1539_v12 = vld [vmem:[%s3466_s2 + $0x58] sm:$0xf0] }
  0x67   :  { %1084 = vmatpush.bf16.msrb.mxu1 %v1878_v9  ;;  %v1542_v24 = vor.u32 %v2144_v11, %v1539_v12  ;;  %v2208_v9 = vld [vmem:[%s3466_s2 + $0x24c] sm:$0xf]  ;;  %v1523_v28 = vld [vmem:[%s3466_s2 + $0x38] sm:$0xf0]  ;;  %v2091_v11 = vld [vmem:[%s3468_s3 + $0xd0] sm:$0xf0] }
  0x68   :  { %1066 = vmatpush.bf16.msrb.mxu0 %v1734_v31  ;;  %1016 = vmatmul.bf16.vlgmr.msra.gmra.mxu1 %v2570_v55  ;;  %v1894_v31 = vor.u32 %v2232_v17, %v1891_v18  ;;  %v2278_v12 = vld [vmem:[%s3468_s3 + $0xac] sm:$0xf]  ;;  %v2097_v17 = vld [vmem:[%s3468_s3 + $0xc8] sm:$0xf] }
  0x6a   :  { %1047 = vmatpush.bf16.msrb.mxu3 %v1606_v25  ;;  %1107 = vmatpush.bf16.msrb.mxu2 %v1942_v47  ;;  %v1795_v25 = vld [vmem:[%s3466_s2 + $0x258] sm:$0xf0]  ;;  %v2106_v47 = vor.u32 %v2287_v34, %v2105_v33  ;;  %v2273_v34 = vld [vmem:[%s3468_s3 + $0x84] sm:$0xf] }
  0x6b   :  { %1085 = vmatpush.bf16.msrb.mxu1 %v1862_v54  ;;  %v1798_v54 = vor.u32 %v2208_v9, %v1795_v25  ;;  %v2098_v9 = vor.u32 %v2284_v19, %v2097_v17  ;;  %v2074_v25 = vor.u32 %v2279_v21, %v2073_v20  ;;  %v2003_v17 = vld [vmem:[%s3468_s3 + $0x18] sm:$0xf0]  ;;  %v1993_v19 = vld [vmem:[%s3468_s3] sm:$0xf]  ;;  %v2259_v20 = vld [vmem:[%s3468_s3 + $0xc] sm:$0xf0] }
  0x6c   :  { %1067 = vmatpush.bf16.msrb.mxu0 %v1718_v41  ;;  %v1654_v41 = vor.u32 %v2172_v29, %v1651_v30  ;;  %v1352_v3 = vand.u32 %v2106_v47, %v1350_v35  ;;  %v2280_v29 = vld [vmem:[%s3468_s3 + $0xb4] sm:$0xf0]  ;;  %v2057_v30 = vld [vmem:[%s3468_s3 + $0x80] sm:$0xf] }
  0x6e   :  { %1048 = vmatpush.bf16.msrb.mxu3 %v1590_v38  ;;  %1108 = vmatpush.bf16.msrb.mxu2 %v1926_v2  ;;  %v1526_v38 = vor.u32 %v2140_v26, %v1523_v28  ;;  %v1763_v2 = vld [vmem:[%s3466_s2 + $0x218] sm:$0xf0]  ;;  %v2081_v26 = vld [vmem:[%s3468_s3 + $0xa8] sm:$0xf] }
  0x6f   :  { %1086 = vmatpush.bf16.msrb.mxu1 %v1846_v58  ;;  %v2113_v58 = vld [vmem:[%s3468_s3 + $0xe8] sm:$0xf]  ;;  %v1766_v14 = vor.u32 %v2200_v1, %v1763_v2  ;;  %v2067_v28 = vld [vmem:[%s3468_s3 + $0x98] sm:$0xf0]  ;;  %v2082_v36 = vor.u32 %v2280_v29, %v2081_v26  ;;  %v2255_v29 = vld [vmem:[%s3469_s1] sm:$0xff] }
  0x70   :  { %1068 = vmatpush.bf16.msrb.mxu0 %v1702_v62  ;;  %v1782_v62 = vor.u32 %v2204_v39, %v1779_v40  ;;  %v2051_v39 = vld [vmem:[%s3468_s3 + $0x78] sm:$0xf0]  ;;  %v2276_v40 = vld [vmem:[%s3468_s3 + $0x94] sm:$0xf0]  ;;  %v2033_v2 = vld [vmem:[%s3468_s3 + $0x48] sm:$0xf] }
  0x71   :  { %v2001_v26 = vld [vmem:[%s3468_s3 + $0x8] sm:$0xf] }
  0x72   :  { %1049 = vmatpush.bf16.msrb.mxu3 %v1574_v59  ;;  %1109 = vmatpush.bf16.msrb.mxu2 %v1910_v16  ;;  %v2288_v59 = vld [vmem:[%s3468_s3 + $0xf4] sm:$0x10]  ;;  %v2090_v16 = vor.u32 %v2283_v7, %v2089_v6  ;;  %v2009_v6 = vld [vmem:[%s3468_s3 + $0x20] sm:$0xf]  ;;  %v2263_v7 = vld [vmem:[%s3468_s3 + $0x2c] sm:$0xf0] }
  0x73   :  { %1087 = vmatpush.bf16.msrb.mxu1 %v1830_v8  ;;  %1002 = vmatmul.bf16.gmra.mxu0 %v2695_v49  ;;  %v2114_v4 = vor.u32 %v2288_v59, %v2113_v58  ;;  %v2102_v8 = vor.u32 %v2282_v60, %v2099_v61  ;;  %v2025_v58 = vld [vmem:[%s3468_s3 + $0x40] sm:$0xf]  ;;  %v2267_v59 = vld [vmem:[%s3468_s3 + $0x4c] sm:$0xf0]  ;;  %v2046_v60 = vor.u32 %v2269_v44, %v2043_v45 }
  0x74   :  { %1069 = vmatpush.bf16.msrb.mxu0 %v1686_v13  ;;  %v2083_v13 = vld [vmem:[%s3468_s3 + $0xb8] sm:$0xf0]  ;;  %v2026_v1 = vor.u32 %v2267_v59, %v2025_v58 }
  0x75   :  { %983 = vmatmul.bf16.gmra.mxu3 %v2682_v42  ;;  %1980 = vmatmul.msk.bf16.gmra.mxu2 %vm798_vm1, %v2693_v48  ;;  %v1358_v15 = vand.u32 %v2114_v4, %v1350_v35  ;;  %v2086_v22 = vor.u32 %v2278_v12, %v2083_v13  ;;  %v2059_v35 = vld [vmem:[%s3468_s3 + $0x90] sm:$0xf0]  ;;  %v2019_v4 = vld [vmem:[%s3468_s3 + $0x38] sm:$0xf0] }
  0x76   :  { %1050 = vmatpush.bf16.msrb.mxu3 %v1558_v10  ;;  %1110 = vmatpush.bf16.msrb.mxu2 %v1894_v31  ;;  %v2281_v10 = vld [vmem:[%s3468_s3 + $0xc4] sm:$0xf]  ;;  %v2275_v31 = vld [vmem:[%s3468_s3 + $0x8c] sm:$0xf0]  ;;  %v2011_v12 = vld [vmem:[%s3468_s3 + $0x30] sm:$0xf0] }
  0x77   :  { %1088 = vmatpush.bf16.msrb.mxu1 %v1814_v23  ;;  %v2094_v18 = vor.u32 %v2281_v10, %v2091_v11  ;;  %v2277_v23 = vld [vmem:[%s3468_s3 + $0xa4] sm:$0xf]  ;;  %v2058_v37 = vor.u32 %v2275_v31, %v2057_v30 }
  0x78   :  { %1070 = vmatpush.bf16.msrb.mxu0 %v1670_v27  ;;  %1021 = vmatmul.bf16.gmra.mxu1 %v2708_v56  ;;  %v2274_v27 = vld [vmem:[%s3468_s3 + $0x8c] sm:$0xf]  ;;  %v2261_v11 = vld [vmem:[%s3468_s3 + $0x24] sm:$0xf] }
  0x79   :  { %v2070_v33 = vor.u32 %v2274_v27, %v2067_v28  ;;  %v2014_v21 = vor.u32 %v2261_v11, %v2011_v12  ;;  %v2260_v27 = vld [vmem:[%s3468_s3 + $0x14] sm:$0xf0] }
  0x7a   :  { %1051 = vmatpush.bf16.msrb.mxu3 %v1542_v24  ;;  %1420 = vmatpush.bf16.msra.mxu2 %v1361_v52  ;;  %v2075_v24 = vld [vmem:[%s3468_s3 + $0xb0] sm:$0xf0] }
  0x7b   :  { %1089 = vmatpush.bf16.msrb.mxu1 %v1798_v54  ;;  %v2078_v32 = vor.u32 %v2277_v23, %v2075_v24  ;;  %v2065_v54 = vld [vmem:[%s3468_s3 + $0x88] sm:$0xf]  ;;  %v1994_v24 = vor.u32 %v2259_v20, %v1993_v19 }
  0x7c   :  { %1071 = vmatpush.bf16.msrb.mxu0 %v1654_v41  ;;  %v2041_v41 = vld [vmem:[%s3468_s3 + $0x60] sm:$0xf]  ;;  %v2066_v47 = vor.u32 %v2276_v40, %v2065_v54 }
  0x7d   :  { %v2042_v52 = vor.u32 %v2271_v43, %v2041_v41 }
  0x7e   :  { %1052 = vmatpush.bf16.msrb.mxu3 %v1526_v38  ;;  %1421 = vmatpush.bf16.msra.mxu2 %v2102_v8  ;;  %v2270_v38 = vld [vmem:[%s3468_s3 + $0x6c] sm:$0xf] }
  0x7f   :  { %1090 = vmatpush.bf16.msrb.mxu1 %v1782_v62  ;;  %v2265_v62 = vld [vmem:[%s3468_s3 + $0x44] sm:$0xf] }
  0x80   :  { %1072 = vmatpush.bf16.msrb.mxu0 %v1638_v0 }
  0x82   :  { %1053 = vmatpush.bf16.msrb.mxu3 %v1510_v63  ;;  %1422 = vmatpush.bf16.msra.mxu2 %v2086_v22  ;;  %v2027_v63 = vld [vmem:[%s3468_s3 + $0x50] sm:$0xf0] }
  0x83   :  { %1091 = vmatpush.bf16.msrb.mxu1 %v1766_v14  ;;  %1073 = vmatmul.bf16.vlgmr.msrb.gmra.mxu0 %v2561_v51  ;;  %v2054_v51 = vor.u32 %v2270_v38, %v2051_v39  ;;  %v2030_v8 = vor.u32 %v2265_v62, %v2027_v63  ;;  %v2010_v14 = vor.u32 %v2263_v7, %v2009_v6  ;;  %v2256_v39 = vld [vmem:[%s3469_s1 + $0x8] sm:$0xff] }
  0x84   :  { %1382 = vmatpush.bf16.msra.mxu0 %v1355_v5  ;;  %v2268_v5 = vld [vmem:[%s3468_s3 + $0x54] sm:$0xf0] }
  0x85   :  { %1054 = vmatmul.bf16.vlgmr.msrb.gmra.mxu3 %v2548_v46  ;;  %1981 = vmatmul.msk.bf16.vlgmr.msrb.gmra.mxu2 %vm798_vm1, %v2559_v50  ;;  %v2062_v46 = vor.u32 %v2273_v34, %v2059_v35  ;;  %v2049_v50 = vld [vmem:[%s3468_s3 + $0x68] sm:$0xf]  ;;  %v2034_v13 = vor.u32 %v2268_v5, %v2033_v2 }
  0x86   :  { %1363 = vmatpush.bf16.msra.mxu3 %v1352_v3  ;;  %1423 = vmatpush.bf16.msra.mxu2 %v2070_v33  ;;  %v2050_v0 = vor.u32 %v2272_v57, %v2049_v50  ;;  %v2262_v3 = vld [vmem:[%s3468_s3 + $0x2c] sm:$0xf] }
  0x87   :  { %1401 = vmatpush.bf16.msra.mxu1 %v1358_v15  ;;  %v2022_v10 = vor.u32 %v2262_v3, %v2019_v4  ;;  %v2017_v15 = vld [vmem:[%s3468_s3 + $0x28] sm:$0xf] }
  0x88   :  { %1383 = vmatpush.bf16.msra.mxu0 %v2094_v18  ;;  %1092 = vmatmul.bf16.vlgmr.msrb.gmra.mxu1 %v2570_v55  ;;  %v2266_v55 = vld [vmem:[%s3468_s3 + $0x4c] sm:$0xf]  ;;  %v2264_v18 = vld [vmem:[%s3468_s3 + $0x34] sm:$0xf0] }
  0x89   :  { %v2038_v61 = vor.u32 %v2266_v55, %v2035_v53  ;;  %v2018_v23 = vor.u32 %v2264_v18, %v2017_v15 }
  0x8a   :  { %1364 = vmatpush.bf16.msra.mxu3 %v2090_v16  ;;  %1424 = vmatpush.bf16.msra.mxu2 %v2054_v51  ;;  %v2258_v16 = vld [vmem:[%s3468_s3 + $0xc] sm:$0xf] }
  0x8b   :  { %1402 = vmatpush.bf16.msra.mxu1 %v2098_v9  ;;  %v2006_v22 = vor.u32 %v2258_v16, %v2003_v17  ;;  %v2257_v9 = vld [vmem:[%s3468_s3 + $0x4] sm:$0xf] }
  0x8c   :  { %1384 = vmatpush.bf16.msra.mxu0 %v2078_v32 }
  0x8e   :  { %1365 = vmatpush.bf16.msra.mxu3 %v2074_v25  ;;  %1425 = vmatpush.bf16.msra.mxu2 %v2038_v61  ;;  %v1995_v25 = vld [vmem:[%s3468_s3 + $0x10] sm:$0xf0] }
  0x8f   :  { %1403 = vmatpush.bf16.msra.mxu1 %v2082_v36  ;;  %v1998_v28 = vor.u32 %v2257_v9, %v1995_v25 }
  0x90   :  { %1385 = vmatpush.bf16.msra.mxu0 %v2062_v46 }
  0x92   :  { %1366 = vmatpush.bf16.msra.mxu3 %v2058_v37  ;;  %1426 = vmatpush.bf16.msra.mxu2 %v2022_v10 }
  0x93   :  { %1404 = vmatpush.bf16.msra.mxu1 %v2066_v47  ;;  %1078 = vmatmul.bf16.gmra.mxu0 %v2695_v49 }
  0x94   :  { %1386 = vmatpush.bf16.msra.mxu0 %v2046_v60 }
  0x95   :  { %1059 = vmatmul.bf16.gmra.mxu3 %v2682_v42  ;;  %1982 = vmatmul.msk.bf16.gmra.mxu2 %vm798_vm1, %v2693_v48  ;;  %v2002_v42 = vor.u32 %v2260_v27, %v2001_v26 }
  0x96   :  { %1367 = vmatpush.bf16.msra.mxu3 %v2042_v52  ;;  %1427 = vmatpush.bf16.msra.mxu2 %v2006_v22 }
  0x97   :  { %1405 = vmatpush.bf16.msra.mxu1 %v2050_v0 }
  0x98   :  { %1387 = vmatpush.bf16.msra.mxu0 %v2030_v8  ;;  %1097 = vmatmul.bf16.gmra.mxu1 %v2708_v56 }
  0x9a   :  { %1368 = vmatpush.bf16.msra.mxu3 %v2026_v1 }
  0x9b   :  { %1406 = vmatpush.bf16.msra.mxu1 %v2034_v13 }
  0x9c   :  { %1388 = vmatpush.bf16.msra.mxu0 %v2014_v21 }
  0x9e   :  { %1369 = vmatpush.bf16.msra.mxu3 %v2010_v14 }
  0x9f   :  { %1407 = vmatpush.bf16.msra.mxu1 %v2018_v23 }
  0xa0   :  { %1389 = vmatpush.bf16.msra.mxu0 %v1998_v28  ;;  %v827_v49 = vpop.f32.mrf.mxu0 }
  0xa1   :  { %v846_v30 = vpop.f32.mrf.mxu1 }
  0xa2   :  { %1370 = vmatpush.bf16.msra.mxu3 %v1994_v24  ;;  %v847_v48 = vadd.f32 %v846_v30, %v827_v49 }
  0xa3   :  { %1408 = vmatpush.bf16.msra.mxu1 %v2002_v42  ;;  %2121 = vmatmul.msk.bf16.vlgmr.msra.gmra.mxu0 %vm1340_vm4, %v2255_v29 }
  0xa5   :  { %2119 = vmatmul.msk.bf16.vlgmr.msra.gmra.mxu3 %vm1340_vm4, %v2255_v29  ;;  %2125 = vmatmul.msk.bf16.vlgmr.msra.gmra.mxu2 %vm1340_vm4, %v2255_v29 }
  0xa8   :  { %2123 = vmatmul.msk.bf16.vlgmr.msra.gmra.mxu1 %vm1340_vm4, %v2255_v29  ;;  %v884_v56 = vpop.f32.mrf.mxu3  ;;  %v865_v31 = vpop.f32.mrf.mxu2 }
  0xa9   :  { %v829_v32 = vpop.f32.mrf.mxu0  ;;  %v866_v33 = vadd.f32 %v865_v31, %v847_v48  ;;  %v848_v34 = vpop.f32.mrf.mxu1 }
  0xaa   :  { %v849_v36 = vadd.f32 %v848_v34, %v829_v32 }
  0xab   :  { %v885_v35 = vadd.f32 %v884_v56, %v866_v33 }
  0xad   :  { %1122 = vst [vmem:[%s3470_s4] sm:$0xff] %v885_v35 }
  0xb0   :  { %v886_v37 = vpop.f32.mrf.mxu3  ;;  %v867_v54 = vpop.f32.mrf.mxu2 }
  0xb1   :  { %v832_v38 = vpop.f32.mrf.mxu0  ;;  %v868_v40 = vadd.f32 %v867_v54, %v849_v36  ;;  %v851_v41 = vpop.f32.mrf.mxu1 }
  0xb2   :  { %v852_v46 = vadd.f32 %v851_v41, %v832_v38 }
  0xb3   :  { %v887_v43 = vadd.f32 %v886_v37, %v868_v40  ;;  %2122 = vmatmul.msk.bf16.gmra.mxu0 %vm1340_vm4, %v2256_v39 }
  0xb5   :  { %2120 = vmatmul.msk.bf16.gmra.mxu3 %vm1340_vm4, %v2256_v39  ;;  %1126 = vst [vmem:[%s3470_s4 + $0x20] sm:$0xff] %v887_v43  ;;  %2126 = vmatmul.msk.bf16.gmra.mxu2 %vm1340_vm4, %v2256_v39 }
  0xb8   :  { %2124 = vmatmul.msk.bf16.gmra.mxu1 %vm1340_vm4, %v2256_v39  ;;  %v889_v51 = vpop.f32.mrf.mxu3  ;;  %v870_v44 = vpop.f32.mrf.mxu2 }
  0xb9   :  { %v834_v45 = vpop.f32.mrf.mxu0  ;;  %v871_v47 = vadd.f32 %v870_v44, %v852_v46  ;;  %v853_v52 = vpop.f32.mrf.mxu1 }
  0xba   :  { %v854_v55 = vadd.f32 %v853_v52, %v834_v45 }
  0xbb   :  { %v890_v50 = vadd.f32 %v889_v51, %v871_v47 }
  0xbd   :  { %1130 = vst [vmem:[%s3470_s4 + $0x40] sm:$0xff] %v890_v50 }
  0xc0   :  { %v891_v53 = vpop.f32.mrf.mxu3  ;;  %v872_v57 = vpop.f32.mrf.mxu2 }
  0xc1   :  { %v873_v58 = vadd.f32 %v872_v57, %v854_v55  ;;  %v922_v59 = vpop.f32.mrf.mxu0 }
  0xc3   :  { %v892_v61 = vadd.f32 %v891_v53, %v873_v58 }
  0xc5   :  { %v941_v60 = vpop.f32.mrf.mxu1  ;;  %1134 = vst [vmem:[%s3470_s4 + $0x60] sm:$0xff] %v892_v61 }
  0xc8   :  { %v903_v62 = vpop.f32.mrf.mxu3  ;;  %v960_v0 = vpop.f32.mrf.mxu2 }
  0xc9   :  { %v923_v63 = vadd.f32 %v922_v59, %v903_v62  ;;  %v924_v1 = vpop.f32.mrf.mxu0 }
  0xcb   :  { %v942_v2 = vadd.f32 %v941_v60, %v923_v63 }
  0xcd   :  { %v943_v3 = vpop.f32.mrf.mxu1  ;;  %v961_v4 = vadd.f32 %v960_v0, %v942_v2 }
  0xcf   :  { %1123 = vst [vmem:[%s3470_s4 + $0x8] sm:$0xff] %v961_v4 }
  0xd0   :  { %v905_v5 = vpop.f32.mrf.mxu3  ;;  %v962_v7 = vpop.f32.mrf.mxu2 }
  0xd1   :  { %v925_v6 = vadd.f32 %v924_v1, %v905_v5  ;;  %v927_v8 = vpop.f32.mrf.mxu0 }
  0xd3   :  { %v944_v10 = vadd.f32 %v943_v3, %v925_v6 }
  0xd5   :  { %v946_v11 = vpop.f32.mrf.mxu1  ;;  %v963_v12 = vadd.f32 %v962_v7, %v944_v10 }
  0xd7   :  { %1127 = vst [vmem:[%s3470_s4 + $0x28] sm:$0xff] %v963_v12 }
  0xd8   :  { %v908_v13 = vpop.f32.mrf.mxu3  ;;  %v965_v15 = vpop.f32.mrf.mxu2 }
  0xd9   :  { %v928_v14 = vadd.f32 %v927_v8, %v908_v13  ;;  %v929_v16 = vpop.f32.mrf.mxu0 }
  0xdb   :  { %v947_v17 = vadd.f32 %v946_v11, %v928_v14 }
  0xdd   :  { %v948_v18 = vpop.f32.mrf.mxu1  ;;  %v966_v19 = vadd.f32 %v965_v15, %v947_v17 }
  0xdf   :  { %1131 = vst [vmem:[%s3470_s4 + $0x48] sm:$0xff] %v966_v19 }
  0xe0   :  { %v910_v20 = vpop.f32.mrf.mxu3  ;;  %v967_v22 = vpop.f32.mrf.mxu2 }
  0xe1   :  { %v930_v21 = vadd.f32 %v929_v16, %v910_v20  ;;  %v998_v23 = vpop.f32.mrf.mxu0 }
  0xe3   :  { %v949_v24 = vadd.f32 %v948_v18, %v930_v21 }
  0xe5   :  { %v1017_v9 = vpop.f32.mrf.mxu1  ;;  %v968_v25 = vadd.f32 %v967_v22, %v949_v24 }
  0xe7   :  { %1135 = vst [vmem:[%s3470_s4 + $0x68] sm:$0xff] %v968_v25 }
  0xe8   :  { %v979_v26 = vpop.f32.mrf.mxu3  ;;  %v1036_v28 = vpop.f32.mrf.mxu2 }
  0xe9   :  { %v999_v27 = vadd.f32 %v998_v23, %v979_v26  ;;  %v1000_v42 = vpop.f32.mrf.mxu0 }
  0xeb   :  { %v1018_v49 = vadd.f32 %v1017_v9, %v999_v27 }
  0xed   :  { %v1019_v29 = vpop.f32.mrf.mxu1  ;;  %v1037_v30 = vadd.f32 %v1036_v28, %v1018_v49 }
  0xef   :  { %1124 = vst [vmem:[%s3470_s4 + $0x10] sm:$0xff] %v1037_v30 }
  0xf0   :  { %v981_v48 = vpop.f32.mrf.mxu3  ;;  %v1038_v31 = vpop.f32.mrf.mxu2 }
  0xf1   :  { %v1001_v56 = vadd.f32 %v1000_v42, %v981_v48  ;;  %v1003_v32 = vpop.f32.mrf.mxu0 }
  0xf3   :  { %v1020_v33 = vadd.f32 %v1019_v29, %v1001_v56 }
  0xf5   :  { %v1022_v34 = vpop.f32.mrf.mxu1  ;;  %v1039_v35 = vadd.f32 %v1038_v31, %v1020_v33 }
  0xf7   :  { %1128 = vst [vmem:[%s3470_s4 + $0x30] sm:$0xff] %v1039_v35 }
  0xf8   :  { %v984_v36 = vpop.f32.mrf.mxu3  ;;  %v1041_v54 = vpop.f32.mrf.mxu2 }
  0xf9   :  { %v1004_v37 = vadd.f32 %v1003_v32, %v984_v36  ;;  %v1005_v38 = vpop.f32.mrf.mxu0 }
  0xfb   :  { %v1023_v39 = vadd.f32 %v1022_v34, %v1004_v37 }
  0xfd   :  { %v1024_v40 = vpop.f32.mrf.mxu1  ;;  %v1042_v41 = vadd.f32 %v1041_v54, %v1023_v39 }
  0xff   :  { %1132 = vst [vmem:[%s3470_s4 + $0x50] sm:$0xff] %v1042_v41 }
 0x100   :  { %v986_v43 = vpop.f32.mrf.mxu3  ;;  %v1043_v51 = vpop.f32.mrf.mxu2 }
 0x101   :  { %v1006_v46 = vadd.f32 %v1005_v38, %v986_v43  ;;  %v1074_v44 = vpop.f32.mrf.mxu0 }
 0x103   :  { %v1025_v45 = vadd.f32 %v1024_v40, %v1006_v46 }
 0x105   :  { %v1093_v47 = vpop.f32.mrf.mxu1  ;;  %v1044_v52 = vadd.f32 %v1043_v51, %v1025_v45 }
 0x107   :  { %1136 = vst [vmem:[%s3470_s4 + $0x70] sm:$0xff] %v1044_v52 }
 0x108   :  { %v1055_v50 = vpop.f32.mrf.mxu3  ;;  %v1112_v53 = vpop.f32.mrf.mxu2 }
 0x109   :  { %v1075_v55 = vadd.f32 %v1074_v44, %v1055_v50  ;;  %v1076_v57 = vpop.f32.mrf.mxu0 }
 0x10b   :  { %v1094_v58 = vadd.f32 %v1093_v47, %v1075_v55 }
 0x10d   :  { %v1095_v59 = vpop.f32.mrf.mxu1  ;;  %v1113_v60 = vadd.f32 %v1112_v53, %v1094_v58 }
 0x10f   :  { %1125 = vst [vmem:[%s3470_s4 + $0x18] sm:$0xff] %v1113_v60 }
 0x110   :  { %v1057_v61 = vpop.f32.mrf.mxu3  ;;  %v1114_v63 = vpop.f32.mrf.mxu2 }
 0x111   :  { %v1077_v62 = vadd.f32 %v1076_v57, %v1057_v61  ;;  %v1079_v0 = vpop.f32.mrf.mxu0 }
 0x113   :  { %v1096_v1 = vadd.f32 %v1095_v59, %v1077_v62 }
 0x115   :  { %v1098_v2 = vpop.f32.mrf.mxu1  ;;  %v1115_v3 = vadd.f32 %v1114_v63, %v1096_v1 }
 0x117   :  { %1129 = vst [vmem:[%s3470_s4 + $0x38] sm:$0xff] %v1115_v3 }
 0x118   :  { %v1060_v4 = vpop.f32.mrf.mxu3  ;;  %v1117_v6 = vpop.f32.mrf.mxu2 }
 0x119   :  { %v1080_v5 = vadd.f32 %v1079_v0, %v1060_v4  ;;  %v1081_v7 = vpop.f32.mrf.mxu0 }
 0x11b   :  { %v1099_v8 = vadd.f32 %v1098_v2, %v1080_v5 }
 0x11d   :  { %v1100_v10 = vpop.f32.mrf.mxu1  ;;  %v1118_v11 = vadd.f32 %v1117_v6, %v1099_v8 }
 0x11f   :  { %1133 = vst [vmem:[%s3470_s4 + $0x58] sm:$0xff] %v1118_v11 }
 0x120   :  { %v1062_v12 = vpop.f32.mrf.mxu3  ;;  %v1119_v14 = vpop.f32.mrf.mxu2 }
 0x121   :  { %v1082_v13 = vadd.f32 %v1081_v7, %v1062_v12  ;;  %v1391_v15 = vpop.f32.mrf.mxu0 }
 0x122   :  { %1440 = vst [vmem:[%s3471_s5 + $0x8] sm:$0xff] %v1391_v15 }
 0x123   :  { %v1101_v16 = vadd.f32 %v1100_v10, %v1082_v13 }
 0x125   :  { %v1410_v17 = vpop.f32.mrf.mxu1  ;;  %v1120_v18 = vadd.f32 %v1119_v14, %v1101_v16 }
 0x126   :  { %1441 = vst [vmem:[%s3471_s5 + $0x10] sm:$0xff] %v1410_v17 }
 0x127   :  { %1137 = vst [vmem:[%s3470_s4 + $0x78] sm:$0xff] %v1120_v18 }
 0x128   :  { %v1372_v19 = vpop.f32.mrf.mxu3  ;;  %v1429_v20 = vpop.f32.mrf.mxu2 }
 0x129   :  { %1439 = vst [vmem:[%s3471_s5] sm:$0xff] %v1372_v19  ;;  %v1393_v21 = vpop.f32.mrf.mxu0 }
 0x12a   :  { %1442 = vst [vmem:[%s3471_s5 + $0x18] sm:$0xff] %v1429_v20 }
 0x12b   :  { %1444 = vst [vmem:[%s3471_s5 + $0x28] sm:$0xff] %v1393_v21 }
 0x12d   :  { %v1412_v22 = vpop.f32.mrf.mxu1 }
 0x12e   :  { %1445 = vst [vmem:[%s3471_s5 + $0x30] sm:$0xff] %v1412_v22 }
 0x130   :  { %v1374_v23 = vpop.f32.mrf.mxu3  ;;  %v1431_v24 = vpop.f32.mrf.mxu2 }
 0x131   :  { %1443 = vst [vmem:[%s3471_s5 + $0x20] sm:$0xff] %v1374_v23  ;;  %v1396_v9 = vpop.f32.mrf.mxu0 }
 0x132   :  { %1446 = vst [vmem:[%s3471_s5 + $0x38] sm:$0xff] %v1431_v24 }
 0x133   :  { %1448 = vst [vmem:[%s3471_s5 + $0x48] sm:$0xff] %v1396_v9 }
 0x135   :  { %v1415_v25 = vpop.f32.mrf.mxu1 }
 0x136   :  { %1449 = vst [vmem:[%s3471_s5 + $0x50] sm:$0xff] %v1415_v25 }
 0x138   :  { %v1377_v26 = vpop.f32.mrf.mxu3  ;;  %v1434_v27 = vpop.f32.mrf.mxu2 }
 0x139   :  { %1447 = vst [vmem:[%s3471_s5 + $0x40] sm:$0xff] %v1377_v26  ;;  %v1398_v28 = vpop.f32.mrf.mxu0 }
 0x13a   :  { %1450 = vst [vmem:[%s3471_s5 + $0x58] sm:$0xff] %v1434_v27 }
 0x13b   :  { %1452 = vst [vmem:[%s3471_s5 + $0x68] sm:$0xff] %v1398_v28 }
 0x13d   :  { %v1417_v42 = vpop.f32.mrf.mxu1 }
 0x13e   :  { %1453 = vst [vmem:[%s3471_s5 + $0x70] sm:$0xff] %v1417_v42 }
 0x140   :  { %v1379_v49 = vpop.f32.mrf.mxu3  ;;  %v1436_v29 = vpop.f32.mrf.mxu2 }
 0x141   :  { %1451 = vst [vmem:[%s3471_s5 + $0x60] sm:$0xff] %v1379_v49 }
 0x142   :  { %1454 = vst [vmem:[%s3471_s5 + $0x78] sm:$0xff] %v1436_v29 }

</bundles_post_ra>
